<compile_context>
chip_gen: v6e
topology: v6e:2x2x1
jax: 0.10.0
libtpu: 0.0.40
codegen_flags: <defaults>
</compile_context>

<pallas_src>
import math
import functools

import jax
import jax.numpy as jnp
from jax import lax
from jax.experimental import pallas as pl
from jax.experimental.pallas import tpu as pltpu


# ---------------------------------------------------------------------------
# Per-generation sizing (v5e/v6e: 128 MiB VMEM; v7x: 64 MiB per TensorCore).
# ---------------------------------------------------------------------------
def _vmem_capacity_bytes():
    try:
        return int(pltpu.get_tpu_info().vmem_capacity_bytes)
    except Exception:
        return 64 * 1024 * 1024            # conservative default (v7x per-TC)


_VMEM_CAP = _vmem_capacity_bytes()
_BIG_VMEM = _VMEM_CAP >= (100 << 20)       # v5e / v6e (128 MiB)
_LIN_TILE_M = 1024 if _BIG_VMEM else 512   # bigger M blocks on 128-MiB parts
_LIN_TILE_N = 512
_LIN_TILE_K = 512
_VMEM_LIMIT = (64 << 20) if _BIG_VMEM else (32 << 20)


def _pick_tile(dim, cap, quantum):
    """Largest t <= cap with t % quantum == 0 and dim % t == 0, else dim.

    Returning `dim` (a full-extent block) is always legal w.r.t. the (8,128)
    rule; a sub-extent block is only chosen when quantum-aligned AND a divisor,
    so the operand is never padded/copied in HBM before the kernel.
    """
    if dim <= cap:
        return dim
    if dim % quantum != 0:
        return dim
    t = (cap // quantum) * quantum
    while t >= quantum:
        if dim % t == 0:
            return t
        t -= quantum
    return dim


# ---------------------------------------------------------------------------
# Grouped tiled linear: out[g] = x @ w[g] + b[g]
#   x: [M, Din]   w: [G, Din, Dout]   b: [G, Dout]   -> out: [G, M, Dout]
# (weights stored [in, out], i.e. transposed vs torch.nn.Linear's [out, in])
# ---------------------------------------------------------------------------
def _linear_kernel(x_ref, w_ref, b_ref, o_ref, acc_ref):
    k = pl.program_id(3)                    # reduction axis (last in the grid)

    @pl.when(k == 0)
    def _():
        acc_ref[...] = jnp.zeros_like(acc_ref)

    # Operands keep their input dtype; MXU accumulates in f32.
    acc_ref[...] += jnp.dot(x_ref[...], w_ref[...],
                            preferred_element_type=jnp.float32)

    @pl.when(k == pl.num_programs(3) - 1)
    def _():
        # Bias added only in the epilogue (once per output tile).
        o_ref[...] = (acc_ref[...] +
                      b_ref[...].astype(jnp.float32)).astype(o_ref.dtype)


def linear(x2d, w, b, *, tile_m=_LIN_TILE_M, tile_n=_LIN_TILE_N,
           tile_k=_LIN_TILE_K):
    """x2d: (M, Din); w: (G, Din, Dout) or (Din, Dout); b: (G, Dout) or (Dout,).
    Returns (G, M, Dout), or (M, Dout) if w was 2-D."""
    squeeze = (w.ndim == 2)
    if squeeze:
        w = w[None]
        b = b[None]
    G, Din, Dout = w.shape
    M = x2d.shape[0]
    b3 = b.reshape(G, 1, Dout)

    tm = _pick_tile(M, tile_m, 8)        # second-to-last dims: multiple of 8
    tn = _pick_tile(Dout, tile_n, 128)   # lane dims: multiple of 128 or full
    tk = _pick_tile(Din, tile_k, 128)

    itemsize = x2d.dtype.itemsize
    cost = pl.CostEstimate(
        flops=2 * G * M * Din * Dout,
        transcendentals=0,
        bytes_accessed=(G * M * Din + G * Din * Dout + G * Dout
                        + G * M * Dout) * itemsize,
    )

    # NOTE: for small-M / large-D shapes, pipeline_mode=pl.Buffered(3) on the
    # weight BlockSpec can hide exposed weight DMA; default 2-deep is fine here.
    out = pl.pallas_call(
        _linear_kernel,
        out_shape=jax.ShapeDtypeStruct((G, M, Dout), x2d.dtype),
        grid_spec=pltpu.PrefetchScalarGridSpec(
            num_scalar_prefetch=0,
            grid=(G, M // tm, Dout // tn, Din // tk),   # reduction axis last
            in_specs=[
                pl.BlockSpec((tm, tk), lambda g, i, j, k: (i, k)),        # x
                pl.BlockSpec((None, tk, tn), lambda g, i, j, k: (g, k, j)),  # w
                pl.BlockSpec((None, 1, tn), lambda g, i, j, k: (g, 0, j)),   # b
            ],
            out_specs=pl.BlockSpec((None, tm, tn),
                                   lambda g, i, j, k: (g, i, j)),
            scratch_shapes=[pltpu.VMEM((tm, tn), jnp.float32)],
        ),
        compiler_params=pltpu.CompilerParams(
            dimension_semantics=("parallel", "parallel", "parallel",
                                 "arbitrary"),
            vmem_limit_bytes=_VMEM_LIMIT),
        cost_estimate=cost,
    )(x2d, w, b3)
    return out[0] if squeeze else out


# ---------------------------------------------------------------------------
# Attention core: hb heads x tq query rows per grid step.
# ---------------------------------------------------------------------------
_MASK_FILL = -1e9    # matches the module's masked_fill_ value


def _attn_kernel(q_ref, k_ref, v_ref, o_ref, *, scale):
    q = q_ref[...]                                   # (hb, tq, dk)
    k = k_ref[...]                                   # (hb, S,  dk)
    v = v_ref[...]                                   # (hb, S,  dk)
    # QK^T with the transpose folded into dot_general (no k.T / XLU transpose).
    s = lax.dot_general(q, k,
                        dimension_numbers=(((2,), (2,)), ((0,), (0,))),
                        preferred_element_type=jnp.float32) * scale
    mx = jnp.max(s, axis=-1, keepdims=True)
    e = jnp.exp(s - mx)
    denom = jnp.sum(e, axis=-1, keepdims=True)
    p = e * pl.reciprocal(denom, approx=True)        # EUP reciprocal, VPU mul
    o = lax.dot_general(p.astype(v.dtype), v,
                        dimension_numbers=(((2,), (1,)), ((0,), (0,))),
                        preferred_element_type=jnp.float32)
    o_ref[...] = o.astype(o_ref.dtype)


def _attn_kernel_masked(q_ref, k_ref, v_ref, m_ref, o_ref, *, scale):
    q = q_ref[...]
    k = k_ref[...]
    v = v_ref[...]
    s = lax.dot_general(q, k,
                        dimension_numbers=(((2,), (2,)), ((0,), (0,))),
                        preferred_element_type=jnp.float32) * scale
    # m_ref is (1, tq, S) int8 (mask shared across heads) or (hb, tq, S) int8.
    s = jnp.where(m_ref[...] == 0, jnp.float32(_MASK_FILL), s)
    mx = jnp.max(s, axis=-1, keepdims=True)
    e = jnp.exp(s - mx)
    denom = jnp.sum(e, axis=-1, keepdims=True)
    p = e * pl.reciprocal(denom, approx=True)
    o = lax.dot_general(p.astype(v.dtype), v,
                        dimension_numbers=(((2,), (1,)), ((0,), (0,))),
                        preferred_element_type=jnp.float32)
    o_ref[...] = o.astype(o_ref.dtype)


def _attention(q3, k3, v3, mask_i8, mask_per_head, num_heads, *, scale,
               tile_q=256):
    BH, S, dk = q3.shape
    H = num_heads
    # Heads per grid step (must divide H so a block never spans two batches,
    # which keeps the shared-mask index_map valid).
    hb = 4 if H % 4 == 0 else (2 if H % 2 == 0 else 1)
    tq = _pick_tile(S, tile_q, 8)

    itemsize = q3.dtype.itemsize
    mask_bytes = 0 if mask_i8 is None else mask_i8.size * mask_i8.dtype.itemsize
    cost = pl.CostEstimate(
        flops=4 * BH * S * S * dk,
        transcendentals=BH * S * S,
        bytes_accessed=4 * BH * S * dk * itemsize + mask_bytes,
    )

    q_spec = pl.BlockSpec((hb, tq, dk), lambda i, qi: (i, qi, 0))
    kv_spec = pl.BlockSpec((hb, S, dk), lambda i, qi: (i, 0, 0))   # resident over qi
    o_spec = pl.BlockSpec((hb, tq, dk), lambda i, qi: (i, qi, 0))

    if mask_i8 is None:
        kern = functools.partial(_attn_kernel, scale=scale)
        in_specs = [q_spec, kv_spec, kv_spec]
        args = (q3, k3, v3)
    else:
        kern = functools.partial(_attn_kernel_masked, scale=scale)
        if mask_per_head:
            m_spec = pl.BlockSpec((hb, tq, S), lambda i, qi: (i, qi, 0))
        else:
            # mask stays (B, S, S): each head block reads its batch's rows, so
            # the (B*H, S, S) head-broadcast copy is never materialized.
            m_spec = pl.BlockSpec((1, tq, S),
                                  lambda i, qi: ((i * hb) // H, qi, 0))
        in_specs = [q_spec, kv_spec, kv_spec, m_spec]
        args = (q3, k3, v3, mask_i8)

    # TODO(synk): for S beyond a few K, switch to an online-softmax (flash)
    # KV-tiled formulation; full-S K/V blocks are fine at BERT-scale S.
    return pl.pallas_call(
        kern,
        out_shape=jax.ShapeDtypeStruct((BH, S, dk), q3.dtype),
        grid_spec=pltpu.PrefetchScalarGridSpec(
            num_scalar_prefetch=0,
            grid=(BH // hb, S // tq),
            in_specs=in_specs,
            out_specs=o_spec,
        ),
        compiler_params=pltpu.CompilerParams(
            dimension_semantics=("parallel", "parallel"),
            vmem_limit_bytes=_VMEM_LIMIT),
        cost_estimate=cost,
    )(*args)


# ---------------------------------------------------------------------------
# Parameter prep (hoisted out of the per-call forward) + full forward.
# ---------------------------------------------------------------------------
def prepare_mha_params(params):
    """Stack QKV weights ONCE so no weight concat/copy happens per forward."""
    return {
        "w_qkv": jnp.stack([params["wq"], params["wk"], params["wv"]]),  # (3,D,D)
        "b_qkv": jnp.stack([params["bq"], params["bk"], params["bv"]]),  # (3,D)
        "wo": params["wo"],
        "bo": params["bo"],
    }


def _prepare_mask(atten_mask, B, H, S):
    """Returns (mask_i8, per_head).  int8 'keep' mask (nonzero = keep), kept at
    (B, S, S) when it does not vary across heads, else (B*H, S, S)."""
    m = jnp.asarray(atten_mask)
    while m.ndim < 4:
        m = m[None]
    keep = (m != 0)
    per_head = m.shape[1] != 1
    if per_head:
        keep = jnp.broadcast_to(keep, (B, H, S, S)).reshape(B * H, S, S)
    else:
        keep = jnp.broadcast_to(keep[:, 0], (B, S, S))
    return keep.astype(jnp.int8), per_head


def multi_head_attention(x, fused_params, num_heads, atten_mask=None):
    """x: [B, S, D]. fused_params from prepare_mha_params (weights are [in,out])."""
    B, S, D = x.shape
    H = num_heads
    dk = D // H
    M = B * S
    x2d = x.reshape(M, D)

    # Fused QKV projection: stacked (3, D, D) weights, (3, M, D) output, so
    # q/k/v are contiguous slabs (no strided column slices in the wrapper).
    qkv = linear(x2d, fused_params["w_qkv"], fused_params["b_qkv"])   # (3, M, D)

    # Exact replica of the module's `.view(B, H, S, d_k)` on the contiguous
    # (B, S, D) tensor: a pure row-major reshape (it mixes seq & feature dims;
    # we preserve those semantics exactly — no transpose(1, 2)).
    q3 = qkv[0].reshape(B * H, S, dk)
    k3 = qkv[1].reshape(B * H, S, dk)
    v3 = qkv[2].reshape(B * H, S, dk)

    mask_i8, per_head = (None, False)
    if atten_mask is not None:
        mask_i8, per_head = _prepare_mask(atten_mask, B, H, S)

    ctx = _attention(q3, k3, v3, mask_i8, per_head, H,
                     scale=1.0 / math.sqrt(dk))                       # (BH, S, dk)

    # `.contiguous().view(B, S, D)` — again a pure reshape in this layout.
    ctx2d = ctx.reshape(M, D)
    out2d = linear(ctx2d, fused_params["wo"], fused_params["bo"])     # (M, D)
    # TODO(synk): torch.nn.Dropout is identity at inference; stochastic dropout
    # (pltpu.prng_*) is intentionally not applied in this forward pass.
    return out2d.reshape(B, S, D)


# ---------------------------------------------------------------------------
# Demo / correctness check.
# ---------------------------------------------------------------------------
if __name__ == "__main__":
    key = jax.random.PRNGKey(0)
    B, S, D, H = 2, 8, 32, 2
    dk = D // H

    keys = jax.random.split(key, 9)
    x = jax.random.normal(keys[0], (B, S, D), dtype=jnp.float32)

    lim = 1.0 / math.sqrt(D)
    def _w(k):  # [in, out] layout
        return jax.random.uniform(k, (D, D), minval=-lim, maxval=lim,
                                  dtype=jnp.float32)
    def _b(k):
        return jax.random.uniform(k, (D,), minval=-lim, maxval=lim,
                                  dtype=jnp.float32)

    params = {
        "wq": _w(keys[1]), "bq": _b(keys[2]),
        "wk": _w(keys[3]), "bk": _b(keys[4]),
        "wv": _w(keys[5]), "bv": _b(keys[6]),
        "wo": _w(keys[7]), "bo": _b(keys[8]),
    }
    fused = prepare_mha_params(params)     # hoisted once, outside the forward

    causal_mask = jnp.tril(jnp.ones((S, S), dtype=jnp.int32))[None, None]  # (1,1,S,S)

    # Pure-JAX reference replicating the PyTorch module exactly (incl. the
    # direct view to (B, H, S, d_k) and -1e9 masked fill).
    def ref_mha(x, mask=None):
        q = x @ params["wq"] + params["bq"]
        k = x @ params["wk"] + params["bk"]
        v = x @ params["wv"] + params["bv"]
        q = q.reshape(B, H, S, dk)
        k = k.reshape(B, H, S, dk)
        v = v.reshape(B, H, S, dk)
        s = jnp.einsum("bhqd,bhkd->bhqk", q, k) / math.sqrt(dk)
        if mask is not None:
            s = jnp.where(mask == 0, jnp.float32(-1e9), s)
        p = jax.nn.softmax(s, axis=-1)
        ctx = jnp.einsum("bhqk,bhkd->bhqd", p, v).reshape(B, S, D)
        return ctx @ params["wo"] + params["bo"]

    # Tolerance is loosened slightly because the softmax normalization uses the
    # EUP approximate reciprocal (pl.reciprocal(approx=True)), ~1e-3 relative.
    TOL = dict(atol=1e-2, rtol=1e-2)

    # No-mask path.
    out = multi_head_attention(x, fused, H, atten_mask=None)
    jax.block_until_ready(out)
    expected = ref_mha(x, None)
    assert out.shape == (B, S, D)
    assert jnp.allclose(out, expected, **TOL), \
        float(jnp.max(jnp.abs(out - expected)))

    # Masked path.
    out_m = multi_head_attention(x, fused, H, atten_mask=causal_mask)
    jax.block_until_ready(out_m)
    expected_m = ref_mha(x, causal_mask)
    assert jnp.allclose(out_m, expected_m, **TOL), \
        float(jnp.max(jnp.abs(out_m - expected_m)))

    print("KERNEL_OK")
</pallas_src>

<mosaic_0001>
module attributes {stable_mosaic.version = 11 : i64} {
  func.func @_linear_kernel(%arg0: i32, %arg1: i32, %arg2: i32, %arg3: i32, %arg4: memref<16x32xf32, #tpu.memory_space<vmem>>, %arg5: memref<1x32x32xf32, #tpu.memory_space<vmem>>, %arg6: memref<1x1x32xf32, #tpu.memory_space<vmem>>, %arg7: memref<1x16x32xf32, #tpu.memory_space<vmem>>, %arg8: memref<16x32xf32, #tpu.memory_space<vmem>>) attributes {dimension_semantics = [#tpu.dimension_semantics<parallel>, #tpu.dimension_semantics<parallel>, #tpu.dimension_semantics<parallel>, #tpu.dimension_semantics<arbitrary>], iteration_bounds = array<i64: 3, 1, 1, 1>, scalar_prefetch = 0 : i64, scratch_operands = 1 : i64, tpu.core_type = #tpu.core_type<tc>, window_params = [{transform_indices = @transform_0, window_bounds = array<i64: 16, 32>}, {transform_indices = @transform_1, window_bounds = array<i64: 1, 32, 32>}, {transform_indices = @transform_2, window_bounds = array<i64: 1, 1, 32>}, {transform_indices = @transform_3, window_bounds = array<i64: 1, 16, 32>}]} {
    %c0_i32 = arith.constant 0 : i32
    %0 = arith.cmpi eq, %arg3, %c0_i32 : i32
    %1 = arith.extui %0 : i1 to i32
    %c0_i32_0 = arith.constant 0 : i32
    %2 = arith.cmpi ne, %1, %c0_i32_0 : i32
    scf.if %2 {
      %cst_11 = arith.constant 0.000000e+00 : f32
      %13 = vector.broadcast %cst_11 : f32 to vector<16x32xf32>
      %c0_12 = arith.constant 0 : index
      %c0_13 = arith.constant 0 : index
      %14 = vector.load %arg8[%c0_12, %c0_13] : memref<16x32xf32, #tpu.memory_space<vmem>>, vector<16x32xf32>
      tpu.vector_store %arg8[%c0_12, %c0_13], %13 {strides = array<i32>} : memref<16x32xf32, #tpu.memory_space<vmem>>, vector<16x32xf32>,
    } else {
    }
    %c0 = arith.constant 0 : index
    %c0_1 = arith.constant 0 : index
    %3 = vector.load %arg8[%c0, %c0_1] : memref<16x32xf32, #tpu.memory_space<vmem>>, vector<16x32xf32>
    %c0_2 = arith.constant 0 : index
    %c0_3 = arith.constant 0 : index
    %4 = vector.load %arg4[%c0_2, %c0_3] : memref<16x32xf32, #tpu.memory_space<vmem>>, vector<16x32xf32>
    %c0_4 = arith.constant 0 : index
    %c0_5 = arith.constant 0 : index
    %c0_6 = arith.constant 0 : index
    %5 = vector.load %arg5[%c0_4, %c0_5, %c0_6] : memref<1x32x32xf32, #tpu.memory_space<vmem>>, vector<1x32x32xf32>
    %6 = vector.shape_cast %5 : vector<1x32x32xf32> to vector<32x32xf32>
    %cst = arith.constant dense<0.000000e+00> : vector<16x32xf32>
    %7 = tpu.matmul %4, %6, %cst {dimension_numbers = #tpu.dot_dimension_numbers<[1], [0], [0], [1], [0, 0, 1, 1], [], []>} : vector<16x32xf32>, vector<32x32xf32>, vector<16x32xf32> -> vector<16x32xf32>
    %8 = arith.addf %3, %7 : vector<16x32xf32>
    %c0_7 = arith.constant 0 : index
    %c0_8 = arith.constant 0 : index
    %9 = vector.load %arg8[%c0_7, %c0_8] : memref<16x32xf32, #tpu.memory_space<vmem>>, vector<16x32xf32>
    tpu.vector_store %arg8[%c0_7, %c0_8], %8 {strides = array<i32>} : memref<16x32xf32, #tpu.memory_space<vmem>>, vector<16x32xf32>,
    %c0_i32_9 = arith.constant 0 : i32
    %10 = arith.cmpi eq, %arg3, %c0_i32_9 : i32
    %11 = arith.extui %10 : i1 to i32
    %c0_i32_10 = arith.constant 0 : i32
    %12 = arith.cmpi ne, %11, %c0_i32_10 : i32
    scf.if %12 {
      %c0_11 = arith.constant 0 : index
      %c0_12 = arith.constant 0 : index
      %13 = vector.load %arg8[%c0_11, %c0_12] : memref<16x32xf32, #tpu.memory_space<vmem>>, vector<16x32xf32>
      %c0_13 = arith.constant 0 : index
      %c0_14 = arith.constant 0 : index
      %c0_15 = arith.constant 0 : index
      %14 = vector.load %arg6[%c0_13, %c0_14, %c0_15] : memref<1x1x32xf32, #tpu.memory_space<vmem>>, vector<1x1x32xf32>
      %15 = vector.shape_cast %14 : vector<1x1x32xf32> to vector<1x32xf32>
      %16 = vector.broadcast %15 : vector<1x32xf32> to vector<16x32xf32>
      %17 = arith.addf %13, %16 : vector<16x32xf32>
      %c0_16 = arith.constant 0 : index
      %c0_17 = arith.constant 0 : index
      %c0_18 = arith.constant 0 : index
      %18 = vector.load %arg7[%c0_16, %c0_17, %c0_18] : memref<1x16x32xf32, #tpu.memory_space<vmem>>, vector<1x16x32xf32>
      %19 = vector.shape_cast %18 : vector<1x16x32xf32> to vector<16x32xf32>
      %20 = vector.shape_cast %17 : vector<16x32xf32> to vector<1x16x32xf32>
      tpu.vector_store %arg7[%c0_16, %c0_17, %c0_18], %20 {strides = array<i32>} : memref<1x16x32xf32, #tpu.memory_space<vmem>>, vector<1x16x32xf32>,
    } else {
    }
    return
  }
  func.func @transform_0(%arg0: i32, %arg1: i32, %arg2: i32, %arg3: i32) -> (i32, i32) {
    %c0_i32 = arith.constant 0 : i32
    return %arg1, %arg3 : i32, i32
  }
  func.func @transform_1(%arg0: i32, %arg1: i32, %arg2: i32, %arg3: i32) -> (i32, i32, i32) {
    %c0_i32 = arith.constant 0 : i32
    return %arg0, %arg3, %arg2 : i32, i32, i32
  }
  func.func @transform_2(%arg0: i32, %arg1: i32, %arg2: i32, %arg3: i32) -> (i32, i32, i32) {
    %c0_i32 = arith.constant 0 : i32
    %c0_i32_0 = arith.constant 0 : i32
    return %arg0, %c0_i32, %arg2 : i32, i32, i32
  }
  func.func @transform_3(%arg0: i32, %arg1: i32, %arg2: i32, %arg3: i32) -> (i32, i32, i32) {
    %c0_i32 = arith.constant 0 : i32
    return %arg0, %arg1, %arg2 : i32, i32, i32
  }
}

</mosaic_0001>

<bundles_post_ra>
// kernel: tpu_custom_call.1
= control target key start
LH: loop header
LB: loop body
LE: loop exit
PB: predicated region body
PF: predicated region fallthrough
CT: control target
= control target key end

     0   :  { %8 = vsyncpa [#allocation4], 0  ;;  %s1021_s0 = inlined_call_operand.hbm [shape: f32[16,32], index: 0, kind: input, shape index: {}]   ;;  %s1022_s1 = inlined_call_operand.hbm [shape: f32[3,32,32], index: 1, kind: input, shape index: {}]   ;;  %s1023_s2 = inlined_call_operand.vmem [shape: f32[3,1,32], index: 2, kind: input, shape index: {}]   ;;  %s1024_s3 = inlined_call_operand.hbm [shape: f32[3,16,32], index: 3, kind: output, shape index: {}]  }
   0x1   :  { %9 = vsyncpa [#allocation7], 0 }
   0x2   :  { %11 = vsyncpa [#allocation7 + $0x1], 0 }
   0x3   :  { %12 = vsyncpa [#allocation5], 0 }
   0x4   :  { %14 = vsyncpa [#allocation5 + $0x1], 0  ;;  %s822_s12 = smov 0   ;;  %s824_s13 = smov 0  }
   0x5   :  { %s826_s14 = smov 0   ;;  %s828_s15 = smov 0  }
   0x6   :  { %s830_s16 = smov 0   ;;  %s832_s17 = smov 0  }
   0x7 LB: > { %s537_s18 = sadd.s32 4294967295, %s792_s17   ;;  %s538_s19 = sadd.s32 4294967294, %s792_s17   ;;  %s792_s17 = sphi %s832_s17, %s20_s17   ;;  %s788_s16 = sphi %s830_s16, %s1045_s16   ;;  %s784_s15 = sphi %s828_s15, %s1044_s15   ;;  %s780_s14 = sphi %s826_s14, %s1043_s14   ;;  %s776_s13 = sphi %s824_s13, %s1042_s13   ;;  %s772_s12 = sphi %s822_s12, %s1041_s12  }
   0x8   : > { %p98_p0 = scmp.ne.s32.totalorder %s776_s13, %s772_s12  ;;  %p856_p1 = scmp.eq.s32.totalorder %s537_s18, 0 }
   0x9   : > { %p860_p2 = scmp.eq.s32.totalorder %s537_s18, 2  ;;  %p160_p3 = scmp.eq.s32.totalorder %s538_s19, 2 }
   0xa   : > { %p866_p4 = por %p856_p1, %p98_p0  ;;  %p539_p5 = scmp.ge.s32.totalorder %s792_s17, 1 }
   0xb   : > { %p871_p6 = por %p160_p3, %p98_p0  ;;  %p167_p7 = scmp.lt.s32.totalorder %s792_s17, 4 }
   0xc   : > { %s794_s25 = smov [#allocation3]   ;;  %s46_s28 = sadd.s32 1, %s788_s16 }
   0xd   : > { %s1031_s23 = scalar_select %p871_p6, 1, 0 }
   0xe   : > { %p876_p8 = pnand %p539_p5, %p167_p7  ;;  %s183_s26 = sshll.u32 %s794_s25, 4  ;;  %s184_s26 = int_to_ptr.vmem [resolvable:$true] %s183_s26 }
   0xf   : > { %s665_s29 = scalar_lea.vmem %s184_s26, 256  ;;  %p673_p3 = scmp.lt.s32.totalorder %s184_s26, %s184_s26 }
  0x10   : > { %p584_p9 = pneg %p876_p8  ;;  %p666_p12 = scmp.ne.s32.totalorder %s184_s26, %s665_s29 }
  0x11   : > { %p674_p5 = scmp.lt.s32.totalorder %s665_s29, %s665_s29 }
  0x12   : > { %p884_p10 = pnand %p584_p9, %p856_p1 }
  0x13   : > { %p675_p7 = por %p674_p5, %p673_p3 }
  0x14   : > { %p656_p11 = pneg %p884_p10 }
  0x16   : > { %p668_p13 = pnand %p666_p12, %p656_p11 }
  0x18   : > { %p669_p0 = pneg %p668_p13 }
  0x1a   : > { %p676_p6 = pnand %p675_p7, %p669_p0 }
  0x1c   : > { %679 = shalt.err (!%p676_p6)
}
  0x1d   : > { %s1025_s30 = smov 128   ;;  %s1026_s4 = smov 8  }
  0x1e   : > { %587 = dma.hbm_to_vmem [thread:$0]  (!%p884_p10), %s1021_s0, 256, %s184_s26, [#allocation4], %s1025_s30, %s1025_s30, %s1026_s4  }
  0x1f   : > { %p48_p6 = scmp.ge.s32.totalorder %s46_s28, 3  ;;  %s85_s7 = sadd.s32 1, %s780_s14 }
  0x20   : > { %p92_p9 = scmp.ne.s32.totalorder %s780_s14, %s776_s13  ;;  %p93_p11 = scmp.eq.s32.totalorder %s792_s17, 0 }
  0x21   : > { %s1047_s28 = smov (%p48_p6, %s46_s28), 0  ;;  %p597_p0 = scmp.lt.s32.totalorder %s792_s17, 3 }
  0x22   : > { %p905_p12 = por %p93_p11, %p92_p9  ;;  %p911_p13 = por %p860_p2, %p92_p9 }
  0x23   : > { %s78_s10 = ssub.s32 %s788_s16, %s1047_s28  ;;  %s197_s11 = sand.u32 1, %s780_s14  }
  0x24   : > { %s1035_s9 = scalar_select %p911_p13, 1, 0 }
  0x25   : > { %p83_p10 = scmp.eq.s32.totalorder %s78_s10, 0  ;;  %s542_s18 = sshll.u32 %s197_s11, 5 }
  0x26   : > { %s557_s25 = sshll.u32 %s788_s16, 9  ;;  %s201_s5 = scalar_lea.vmem [#allocation6], %s542_s18 }
  0x27   : > { %s920_s19 = scalar_select %p83_p10, %s780_s14, %s85_s7  }
  0x28   : > { %s210_s29 = scalar_lea.hbm %s1022_s1, %s557_s25  ;;  %s211_s6 = sshll.u32 %s201_s5, 4  ;;  %s212_s6 = int_to_ptr.vmem [resolvable:$true] %s211_s6 }
  0x29   : > { %p928_p2 = pnand %p597_p0, %p905_p12  ;;  %s198_s30 = scalar_lea.sflag [#allocation7], %s197_s11 }
  0x2a   : > { %s693_s10 = scalar_lea.vmem %s212_s6, 512  ;;  %s797_s7 = smov [#allocation6]  }
  0x2b   : > { %p682_p3 = pneg %p928_p2  ;;  %p694_p5 = scmp.ne.s32.totalorder %s212_s6, %s693_s10 }
  0x2c   : > { %s698_s4 = sshll.u32 %s797_s7, 4  ;;  %s699_s4 = int_to_ptr.vmem [resolvable:$false] %s698_s4 }
  0x2d   : > { %p696_p7 = pnand %p694_p5, %p682_p3  ;;  %s700_s25 = scalar_lea.vmem %s699_s4, 1024 }
  0x2e   : > { %p701_p9 = scmp.lt.s32.totalorder %s212_s6, %s699_s4  ;;  %p702_p11 = scmp.lt.s32.totalorder %s700_s25, %s693_s10 }
  0x2f   : > { %p697_p6 = pneg %p696_p7 }
  0x30   : > { %p703_p10 = por %p702_p11, %p701_p9 }
  0x32   : > { %p704_p13 = pnand %p703_p10, %p697_p6 }
  0x34   : > { %707 = shalt.err (!%p704_p13)
}
  0x35   : > { %s1037_s8 = smov 8   ;;  %s1038_s18 = smov 128  }
  0x36   : > { %591 = dma.hbm_to_vmem [thread:$0]  (!%p928_p2), %s210_s29, 512, %s212_s6, %s198_s30, %s1038_s18, %s1038_s18, %s1037_s8  }
  0x37   : > { %232 = sbr.rel (%p876_p8) target bundleno = 295 (0x127), region = 32 }
  0x3c   : > { %759 = dma.done.wait (%p856_p1), [#allocation4], 256  }
  0x3d   : > { %761 = vsyncadd (%p856_p1), [#allocation4], 4294967040  ;;  %s946_s4 = sand.u32 1, %s776_s13  }
  0x3e   : > { %s547_s11 = sshll.u32 %s946_s4, 5  ;;  %s239_s26 = scalar_lea.sflag [#allocation7], %s946_s4 }
  0x3f   : > { %s242_s27 = scalar_lea.vmem [#allocation6], %s547_s11 }
  0x40   : > { %763 = dma.done.wait (%p866_p4), %s239_s26, 512  }
  0x41   : > { %765 = vsyncadd (%p866_p4), %s239_s26, 4294966784  ;;  %vm284_vm0 = vcmask 261120   ;;  %v798_v0 = vmov 0.0   ;;  %v294_v1 = vld [vmem:[%s242_s27 + $0x18] sm:$0xff]  ;;  %v293_v2 = vld [vmem:[%s242_s27 + $0x10] sm:$0xff]  ;;  %p273_p1 = scmp.lt.s32.totalorder %s784_s15, 2 }
  0x42   : > { %286 = vst.msk [vmem:[#allocation2 + $0x8] sm:$0xff] %vm284_vm0, %v798_v0  ;;  %285 = vst.msk [vmem:[#allocation2] sm:$0xff] %vm284_vm0, %v798_v0  ;;  %565 = vmatprep.subr.mxu0 %v294_v1  ;;  %v289_v3 = vld [vmem:[#allocation3] sm:$0xff]  ;;  %v292_v4 = vld [vmem:[%s242_s27 + $0x8] sm:$0xff]  ;;  %s548_s22 = sshll.u32 %s946_s4, 4  ;;  %s558_s5 = sshll.u32 %s784_s15, 8 }
  0x43   : > { %566 = vmatpush3.msra.mxu0 %v294_v1  ;;  %573 = vmatprep.mubr.msk.f32.mxu0 %vm284_vm0, %v289_v3  ;;  %v291_v5 = vld [vmem:[%s242_s27] sm:$0xff]  ;;  %v290_v6 = vld [vmem:[#allocation3 + $0x8] sm:$0xff]  ;;  %s274_s20 = scalar_select %p273_p1, %s784_s15, 2 }
  0x44   : > { %567 = vmatprep.subr.mxu0 %v293_v2  ;;  %s270_s6 = scalar_lea.vmem [#allocation8], %s548_s22  ;;  %s970_s25 = scalar_lea.hbm %s1024_s3, %s558_s5 }
  0x45   : > { %568 = vmatpush3.msra.mxu0 %v293_v2  ;;  %s278_s29 = scalar_lea.vmem %s1023_s2, %s274_s20  ;;  %s414_s21 = sshll.u32 %s270_s6, 4  ;;  %s972_s21 = int_to_ptr.vmem [resolvable:$true] %s414_s21 }
  0x46   : > { %569 = vmatprep.subr.mxu0 %v292_v4  ;;  %v551_v13 = vld [vmem:[%s278_s29] ss:$0 sm:$0xff]  ;;  %s398_s15 = scalar_lea.sflag [#allocation5], %s946_s4  ;;  %s708_s8 = scalar_lea.vmem %s972_s21, 256 }
  0x47   : > { %570 = vmatpush3.msra.mxu0 %v292_v4  ;;  %p709_p4 = scmp.ne.s32.totalorder %s972_s21, %s708_s8  ;;  %p1039_p8 = scmp.ne.s32.totalorder %s1035_s9, 0 }
  0x48   : > { %571 = vmatprep.subr.mxu0 %v291_v5  ;;  %s799_s18 = smov [#allocation8]  }
  0x49   : > { %572 = vmatpush3.msra.mxu0 %v291_v5  ;;  %v288_v7 = vld [vmem:[#allocation2 + $0x8] sm:$0xff]  ;;  %v287_v9 = vld [vmem:[#allocation2] sm:$0xff]  ;;  %p710_p12 = pnand %p709_p4, %p1039_p8  ;;  %s712_s11 = sshll.u32 %s799_s18, 4  ;;  %s713_s11 = int_to_ptr.vmem [resolvable:$false] %s712_s11 }
  0x4a   : > { %574 = vmatmul.mubr.msk.f32.vlgmr.msra.gmra.mxu0 %vm284_vm0, %v290_v6  ;;  %s714_s26 = scalar_lea.vmem %s713_s11, 512  ;;  %p715_p0 = scmp.lt.s32.totalorder %s972_s21, %s713_s11 }
  0x4b   : > { %p711_p13 = pneg %p710_p12  ;;  %p716_p2 = scmp.lt.s32.totalorder %s714_s26, %s708_s8 }
  0x4d   : > { %p717_p3 = por %p716_p2, %p715_p0 }
  0x4f   : > { %p718_p5 = pnand %p717_p3, %p711_p13 }
 0x10a   : > { %v575_v8 = vpop.f32.mrf.mxu0 }
 0x10b   : > { %v378_v10 = vadd.f32 %v575_v8, %v288_v7 }
 0x10c   : > { %v368_v11 = vpop.f32.mrf.mxu0 }
 0x10d   : > { %380 = vst.msk [vmem:[#allocation2 + $0x8] sm:$0xff] %vm284_vm0, %v378_v10  ;;  %v377_v12 = vadd.f32 %v368_v11, %v287_v9 }
 0x10f   : > { %379 = vst.msk [vmem:[#allocation2] sm:$0xff] %vm284_vm0, %v377_v12 }
 0x114   : > { %v385_v14 = vld [vmem:[#allocation2 + $0x8] sm:$0xff] }
 0x115   : > { %v394_v15 = vadd.f32 %v551_v13, %v385_v14 }
 0x116   : > { %v384_v16 = vld [vmem:[#allocation2] sm:$0xff] }
 0x117   : > { %v393_v17 = vadd.f32 %v551_v13, %v384_v16  ;;  %396 = vst.msk [vmem:[%s270_s6 + $0x8] sm:$0xff] %vm284_vm0, %v394_v15 }
 0x119   : > { %395 = vst.msk [vmem:[%s270_s6] sm:$0xff] %vm284_vm0, %v393_v17 }
 0x11a   : > { %721 = shalt.err (!%p718_p5)
}
 0x11b   : > { %s722_s27 = scalar_lea.hbm %s970_s25, 256  ;;  %s726_s24 = scalar_lea.hbm %s1024_s3, 768 }
 0x11c   : > { %p723_p7 = scmp.ne.s32.totalorder %s970_s25, %s722_s27  ;;  %p727_p11 = scmp.lt.s32.totalorder %s970_s25, %s1024_s3 }
 0x11d   : > { %p728_p10 = scmp.lt.s32.totalorder %s726_s24, %s722_s27 }
 0x11e   : > { %p724_p6 = pnand %p723_p7, %p1039_p8 }
 0x11f   : > { %p729_p1 = por %p728_p10, %p727_p11 }
 0x120   : > { %p725_p9 = pneg %p724_p6 }
 0x122   : > { %p730_p4 = pnand %p729_p1, %p725_p9 }
 0x124   : > { %733 = shalt.err (!%p730_p4)
}
 0x125   : > { %s800_s5 = smov 128   ;;  %s801_s6 = smov 8  }
 0x126   : > { %582 = dma.vmem_to_hbm [thread:$0]  (%p1039_p8), %s972_s21, 256, %s970_s25, %s398_s15, %s800_s5, %s800_s5, %s801_s6  }
 0x127 PF: > { %p599_p12 = scmp.ge.s32.totalorder %s792_s17, 2  ;;  %s429_s10 = sand.u32 1, %s772_s12  }
 0x128   : > { %p1040_p13 = scmp.ne.s32.totalorder %s1031_s23, 0  ;;  %s430_s7 = scalar_lea.sflag [#allocation5], %s429_s10 }
 0x12a   : > { %p593_p0 = pnand %p599_p12, %p1040_p13 }
 0x12c   : > { %p594_p2 = pneg %p593_p0 }
 0x12e   : > { %767 = dma.done.wait (%p594_p2), %s430_s7, 256  }
 0x12f   : > { %769 = vsyncadd (%p594_p2), %s430_s7, 4294967040  ;;  %s20_s17 = sadd.s32 1, %s792_s17   ;;  %s1041_s12 = smov %s776_s13 }
 0x130   : > { %p17_p3 = scmp.ge.s32.totalorder %s20_s17, 5   ;;  %s1042_s13 = smov %s780_s14 }
 0x131   : > { %s1043_s14 = smov %s920_s19  ;;  %s1044_s15 = smov %s788_s16 }
 0x132   : > { %s1045_s16 = smov %s1047_s28  ;;  %19 = sbr.rel (!%p17_p3) target bundleno = 7 (0x7), region = 94 }
 0x137   :  { %435 = vsyncpa [#allocation4], 1 }
 0x138   :  { %437 = vsyncpa [#allocation4 + $0x1], 1 }
 0x139   :  { %438 = vsyncpa [#allocation7], 1 }
 0x13a   :  { %440 = vsyncpa [#allocation7 + $0x1], 1 }
 0x13b   :  { %441 = vsyncpa [#allocation5], 1 }
 0x13c   :  { %443 = vsyncpa [#allocation5 + $0x1], 1 }

</bundles_post_ra>
